<compile_context>
chip_gen: v7x
topology: tpu7x:2x2x1
jax: 0.10.0
libtpu: 0.0.40
codegen_flags: <defaults>
</compile_context>

<pallas_src>
import jax
import jax.numpy as jnp
from jax.experimental import pallas as pl
from jax.experimental.pallas import tpu as pltpu


_IN_BUF_BYTES = 12 * 1024 * 1024    # per-pipeline-buffer input budget (dtype-aware)
_TL_CHUNK = 4096                    # lane chunk for very long signals (mult. of 128)
_TM_MAX = 4096                      # row-tile ceiling
_TM_MIN_FULL_ROW = 64               # below this many full-length rows/block -> chunk L
_VMEM_LIMIT = 48 * 1024 * 1024      # < v7x 64 MiB physical; > v5e 16 MiB scoped default


def _round_up(x, m):
    return ((x + m - 1) // m) * m


def _choose_row_tile(R, tl, itemsize):
    """Row tile sized against the per-buffer VMEM budget (in the input dtype)."""
    rows_by_budget = max(8, (_IN_BUF_BYTES // (tl * itemsize)) // 8 * 8)
    tm = min(_TM_MAX, _round_up(R, 8), rows_by_budget)
    # Keep >= 2 row tiles when R allows it so the "parallel" row axis can shard
    # across the two TensorCores of a v7x chip (no-op for small R).
    half_rows = max(8, _round_up((R + 1) // 2, 8))
    tm = min(tm, half_rows)
    return tm


def _make_single_chunk_kernel(L):
    """Whole length fits one block: no accumulators, one reduce per row tile."""
    inv_l = 1.0 / float(L)

    def kernel(x_ref, avg_ref, max_ref):
        x = x_ref[...].astype(jnp.float32)                       # (tm, L)
        avg_ref[...] = (jnp.sum(x, axis=-1, keepdims=True) * inv_l).astype(avg_ref.dtype)
        max_ref[...] = jnp.max(x, axis=-1, keepdims=True).astype(max_ref.dtype)

    return kernel


def _make_chunked_kernel(L, tl):
    """Length-chunked reduction with dense (tm, 128) VPU accumulators."""
    assert tl % 128 == 0
    ngroups = tl // 128
    has_remainder = (L % tl) != 0
    inv_l = 1.0 / float(L)

    def kernel(x_ref, avg_ref, max_ref, sum_acc, max_acc):
        k = pl.program_id(1)
        last = pl.num_programs(1) - 1

        @pl.when(k == 0)
        def _init():
            sum_acc[...] = jnp.zeros_like(sum_acc)
            max_acc[...] = jnp.full_like(max_acc, -jnp.inf)

        x = x_ref[...].astype(jnp.float32)                       # (tm, tl)

        def _accum(x_sum, x_max):
            # Fold lane groups into (tm, 128) with pure VALU ops (static,
            # vreg-aligned 128-lane slices); the single cross-lane (XLU)
            # reduce is deferred to the finalize step below.
            s = x_sum[:, 0:128]
            m = x_max[:, 0:128]
            for g in range(1, ngroups):
                lo, hi = g * 128, (g + 1) * 128
                s = s + x_sum[:, lo:hi]
                m = jnp.maximum(m, x_max[:, lo:hi])
            sum_acc[...] += s
            max_acc[...] = jnp.maximum(max_acc[...], m)

        if has_remainder:
            # Masking only runs on the final (ragged) length chunk.
            @pl.when(k != last)
            def _plain():
                _accum(x, x)

            @pl.when(k == last)
            def _masked():
                lane = jax.lax.broadcasted_iota(jnp.int32, x.shape, 1)
                valid = (k * tl + lane) < L
                _accum(jnp.where(valid, x, 0.0),
                       jnp.where(valid, x, -jnp.inf))
        else:
            _accum(x, x)

        @pl.when(k == last)
        def _finalize():
            avg_ref[...] = (jnp.sum(sum_acc[...], axis=-1, keepdims=True)
                            * inv_l).astype(avg_ref.dtype)
            max_ref[...] = jnp.max(max_acc[...], axis=-1,
                                   keepdims=True).astype(max_ref.dtype)

    return kernel


def _pooled_rows(x2d, *, chunk_tl=None):
    """x2d: (R, L) -> (avg (R, 1), max (R, 1)) via a Pallas reduction kernel.

    chunk_tl forces the length-chunked path (testing hook)."""
    R, L = x2d.shape
    itemsize = jnp.dtype(x2d.dtype).itemsize

    if chunk_tl is not None:
        chunked, tl = True, int(chunk_tl)
    else:
        # Single-chunk unless a full-length block would hold < _TM_MIN_FULL_ROW
        # rows at the per-buffer budget.
        chunked = _TM_MIN_FULL_ROW * L * itemsize > _IN_BUF_BYTES
        tl = _TL_CHUNK if chunked else L

    tm = _choose_row_tile(R, tl, itemsize)
    out_shape = (jax.ShapeDtypeStruct((R, 1), x2d.dtype),
                 jax.ShapeDtypeStruct((R, 1), x2d.dtype))

    if not chunked:
        grid = (pl.cdiv(R, tm),)
        fn = pl.pallas_call(
            _make_single_chunk_kernel(L),
            out_shape=out_shape,
            grid_spec=pltpu.PrefetchScalarGridSpec(
                num_scalar_prefetch=0,
                grid=grid,
                in_specs=[pl.BlockSpec((tm, L), lambda i: (i, 0))],
                out_specs=[pl.BlockSpec((tm, 1), lambda i: (i, 0)),
                           pl.BlockSpec((tm, 1), lambda i: (i, 0))],
            ),
            compiler_params=pltpu.CompilerParams(
                dimension_semantics=("parallel",),
                vmem_limit_bytes=_VMEM_LIMIT,
            ),
        )
    else:
        grid = (pl.cdiv(R, tm), pl.cdiv(L, tl))
        fn = pl.pallas_call(
            _make_chunked_kernel(L, tl),
            out_shape=out_shape,
            grid_spec=pltpu.PrefetchScalarGridSpec(
                num_scalar_prefetch=0,
                grid=grid,
                in_specs=[pl.BlockSpec((tm, tl), lambda i, k: (i, k))],
                out_specs=[pl.BlockSpec((tm, 1), lambda i, k: (i, 0)),
                           pl.BlockSpec((tm, 1), lambda i, k: (i, 0))],
                scratch_shapes=[pltpu.VMEM((tm, 128), jnp.float32),   # running sum
                                pltpu.VMEM((tm, 128), jnp.float32)],  # running max
            ),
            compiler_params=pltpu.CompilerParams(
                dimension_semantics=("parallel", "arbitrary"),
                vmem_limit_bytes=_VMEM_LIMIT,
            ),
        )
    return fn(x2d)


def pool_mod(x):
    """Forward of PoolMod: x (N, C, L) -> (N, 2*C, 1) = cat([avg, max], dim=1)."""
    N, C, L = x.shape
    x2d = x.reshape(N * C, L)
    avg, mx = _pooled_rows(x2d)
    avg = avg.reshape(N, C, 1)
    mx = mx.reshape(N, C, 1)
    # O(N*C) bytes; negligible next to the (N*C*L) input stream.
    return jnp.concatenate([avg, mx], axis=1)


def _reference(x):
    return jnp.concatenate(
        [jnp.mean(x, axis=-1, keepdims=True), jnp.max(x, axis=-1, keepdims=True)],
        axis=1,
    )


if __name__ == "__main__":
    key = jax.random.PRNGKey(0)
    k1, k2, k3 = jax.random.split(key, 3)

    # Primary small example consistent with 1-D pooling: (batch, channels, length).
    x = jax.random.normal(key, (2, 4, 16), dtype=jnp.float32)
    out = jax.block_until_ready(pool_mod(x))
    assert out.shape == (2, 8, 1), out.shape
    assert jnp.allclose(out, _reference(x), atol=1e-5, rtol=1e-5)

    # Boundary-block path: row count not a multiple of the row tile.
    x2 = jax.random.normal(k1, (2, 3, 200), dtype=jnp.float32)
    out2 = jax.block_until_ready(pool_mod(x2))
    assert out2.shape == (2, 6, 1), out2.shape
    assert jnp.allclose(out2, _reference(x2), atol=1e-5, rtol=1e-5)

    # Longer signal (still single-chunk at the 12 MiB budget).
    x3 = jax.random.normal(k2, (2, 2, 2500), dtype=jnp.float32)
    out3 = jax.block_until_ready(pool_mod(x3))
    assert out3.shape == (2, 4, 1), out3.shape
    assert jnp.allclose(out3, _reference(x3), atol=1e-5, rtol=1e-5)

    # Force the length-chunked accumulator kernel at small scale:
    #  (a) ragged final chunk (masked), (b) exact-multiple chunks (unmasked).
    x3_2d = x3.reshape(-1, x3.shape[-1])
    avg_c, max_c = jax.block_until_ready(_pooled_rows(x3_2d, chunk_tl=256))
    assert jnp.allclose(avg_c[:, 0], jnp.mean(x3_2d, axis=-1), atol=1e-5, rtol=1e-5)
    assert jnp.allclose(max_c[:, 0], jnp.max(x3_2d, axis=-1), atol=1e-5, rtol=1e-5)

    x4 = jax.random.normal(k3, (16, 512), dtype=jnp.float32)
    avg_c2, max_c2 = jax.block_until_ready(_pooled_rows(x4, chunk_tl=128))
    assert jnp.allclose(avg_c2[:, 0], jnp.mean(x4, axis=-1), atol=1e-5, rtol=1e-5)
    assert jnp.allclose(max_c2[:, 0], jnp.max(x4, axis=-1), atol=1e-5, rtol=1e-5)

    # bf16 path: exercises dtype-aware tile sizing; accumulation stays in f32.
    xb = jax.random.normal(k3, (2, 4, 384), dtype=jnp.float32).astype(jnp.bfloat16)
    outb = jax.block_until_ready(pool_mod(xb))
    refb = _reference(xb.astype(jnp.float32)).astype(jnp.bfloat16)
    assert outb.shape == (2, 8, 1), outb.shape
    assert jnp.allclose(outb.astype(jnp.float32), refb.astype(jnp.float32),
                        atol=2e-2, rtol=2e-2)

    print("KERNEL_OK")
</pallas_src>

<mosaic_0001>
module attributes {stable_mosaic.version = 11 : i64} {
  func.func @kernel(%arg0: i32, %arg1: memref<8x16xf32, #tpu.memory_space<vmem>>, %arg2: memref<8x1xf32, #tpu.memory_space<vmem>>, %arg3: memref<8x1xf32, #tpu.memory_space<vmem>>) attributes {dimension_semantics = [#tpu.dimension_semantics<parallel>], iteration_bounds = array<i64: 1>, scalar_prefetch = 0 : i64, scratch_operands = 0 : i64, tpu.core_type = #tpu.core_type<tc>, window_params = [{transform_indices = @transform_0, window_bounds = array<i64: 8, 16>}, {transform_indices = @transform_1, window_bounds = array<i64: 8, 1>}, {transform_indices = @transform_2, window_bounds = array<i64: 8, 1>}]} {
    %c0 = arith.constant 0 : index
    %c0_0 = arith.constant 0 : index
    %0 = vector.load %arg1[%c0, %c0_0] : memref<8x16xf32, #tpu.memory_space<vmem>>, vector<8x16xf32>
    %cst = arith.constant dense<0.000000e+00> : vector<8xf32>
    %1 = vector.multi_reduction <add>, %0, %cst [1] : vector<8x16xf32> to vector<8xf32>
    %2 = vector.shape_cast %1 : vector<8xf32> to vector<8x1xf32>
    %cst_1 = arith.constant 6.250000e-02 : f32
    %3 = vector.broadcast %cst_1 : f32 to vector<8x1xf32>
    %4 = arith.mulf %2, %3 : vector<8x1xf32>
    %c0_2 = arith.constant 0 : index
    %c0_3 = arith.constant 0 : index
    %5 = vector.load %arg2[%c0_2, %c0_3] : memref<8x1xf32, #tpu.memory_space<vmem>>, vector<8x1xf32>
    tpu.vector_store %arg2[%c0_2, %c0_3], %4 {strides = array<i32>} : memref<8x1xf32, #tpu.memory_space<vmem>>, vector<8x1xf32>,
    %cst_4 = arith.constant dense<0xFF800000> : vector<8xf32>
    %6 = vector.multi_reduction <maximumf>, %0, %cst_4 [1] : vector<8x16xf32> to vector<8xf32>
    %7 = vector.shape_cast %6 : vector<8xf32> to vector<8x1xf32>
    %c0_5 = arith.constant 0 : index
    %c0_6 = arith.constant 0 : index
    %8 = vector.load %arg3[%c0_5, %c0_6] : memref<8x1xf32, #tpu.memory_space<vmem>>, vector<8x1xf32>
    tpu.vector_store %arg3[%c0_5, %c0_6], %7 {strides = array<i32>} : memref<8x1xf32, #tpu.memory_space<vmem>>, vector<8x1xf32>,
    return
  }
  func.func @transform_0(%arg0: i32) -> (i32, i32) {
    %c0_i32 = arith.constant 0 : i32
    %c0_i32_0 = arith.constant 0 : i32
    return %arg0, %c0_i32 : i32, i32
  }
  func.func @transform_1(%arg0: i32) -> (i32, i32) {
    %c0_i32 = arith.constant 0 : i32
    %c0_i32_0 = arith.constant 0 : i32
    return %arg0, %c0_i32 : i32, i32
  }
  func.func @transform_2(%arg0: i32) -> (i32, i32) {
    %c0_i32 = arith.constant 0 : i32
    %c0_i32_0 = arith.constant 0 : i32
    return %arg0, %c0_i32 : i32, i32
  }
}

</mosaic_0001>

<bundles_post_ra>
// kernel: tpu_custom_call.1
= control target key start
LH: loop header
LB: loop body
LE: loop exit
PB: predicated region body
PF: predicated region fallthrough
CT: control target
= control target key end

     0   :  { %8 = vsyncpa [#allocation3], 0  ;;  %s68_s9 = smov [#allocation2]   ;;  %s102_s0 = inlined_call_operand.hbm [shape: f32[8,16], index: 0, kind: input, shape index: {}]   ;;  %s103_s1 = inlined_call_operand.vmem [shape: f32[8,1], index: 1, kind: output, shape index: {0}]   ;;  %s104_s2 = inlined_call_operand.vmem [shape: f32[8,1], index: 2, kind: output, shape index: {1}]  }
   0x1   :  { %s15_s10 = sshll.u32 %s68_s9, 4  ;;  %s44_s13 = scalar_lea.hbm %s102_s0, 128  ;;  %s16_s10 = int_to_ptr.vmem [resolvable:$true] %s15_s10 }
   0x2   :  { %p45_p0 = scmp.ne.s32.totalorder %s102_s0, %s44_s13  ;;  %p48_p1 = scmp.lt.u32.totalorder %s44_s13, %s102_s0 }
   0x4   :  { %p50_p2 = pnand %p48_p1, %p45_p0 }
   0x6   :  { %53 = shalt.err (!%p50_p2)
}
   0x7   :  { %s54_s18 = scalar_lea.vmem %s16_s10, 128  ;;  %p59_p4 = scmp.lt.s32.totalorder %s16_s10, %s16_s10 }
   0x8   :  { %p55_p3 = scmp.ne.s32.totalorder %s16_s10, %s54_s18  ;;  %p60_p5 = scmp.lt.s32.totalorder %s54_s18, %s54_s18 }
   0xa   :  { %p61_p6 = por %p60_p5, %p59_p4 }
   0xc   :  { %p62_p7 = pnand %p61_p6, %p55_p3 }
   0xe   :  { %65 = shalt.err (!%p62_p7)
}
   0xf   :  { %18 = dma.hbm_to_vmem [thread:$0]  %s102_s0, 128, %s16_s10, [#allocation3]  }
  0x10   :  { %66 = dma.done.wait [#allocation3], 128  }
  0x11   :  { %67 = vsyncadd [#allocation3], 4294967168  ;;  %vm23_vm0 = vcmask 130048   ;;  %v22_v0 = vld [vmem:[#allocation2] sm:$0xff]  ;;  %vm28_vm1 = vcmask 7168  }
  0x12   :  { %v24_v1 = vsel %vm23_vm0, %v22_v0, 0.0  ;;  %v30_v2 = vsel %vm23_vm0, %v22_v0, -inf }
  0x13   :  { %25 = vadd.xlane.f32.xlu0 %v24_v1 }
  0x17   :  { %31 = vmax.xlane.f32.xlu0 %v30_v2 }
  0xa0   :  { %v26_v3 = vpop.xlane.xlu0 %25 }
  0xa1   :  { %v27_v4 = vmul.f32 0.0625, %v26_v3 }
  0xa3   :  { %29 = vst.msk [vmem:[%s103_s1] sm:$0xff] %vm28_vm1, %v27_v4 }
  0xa4   :  { %v32_v5 = vpop.xlane.xlu0 %31 }
  0xa5   :  { %33 = vst.msk [vmem:[%s104_s2] sm:$0xff] %vm28_vm1, %v32_v5 }
  0xa6   :  { %42 = vsyncpa [#allocation3], 1 }

</bundles_post_ra>
